<compile_context>
chip_gen: v5e
topology: v5e:2x2
jax: 0.10.0
libtpu: 0.0.40
codegen_flags: <defaults>
</compile_context>

<pallas_src>
import functools

import jax
import jax.numpy as jnp
from jax.experimental import pallas as pl
from jax.experimental.pallas import tpu as pltpu


def transe_score_kernel(h_ref, r_ref, t_ref, o_ref):
    """Per-tile TransE score on a (D, TB) tile: -||h + r - t||_2 over D."""
    h = h_ref[...].astype(jnp.float32)
    r = r_ref[...].astype(jnp.float32)
    t = t_ref[...].astype(jnp.float32)
    d = h + r - t                                   # (D, TB) elementwise (VPU)
    ssq = jnp.sum(d * d, axis=0, keepdims=True)     # (1, TB) sublane reduce (XLU)
    o_ref[...] = -jnp.sqrt(ssq)                     # matches torch.norm(p=2, dim=1)


@functools.partial(jax.jit, static_argnames=("tb",))
def transe_forward(entity_emb, relation_emb, head, relation, tail, *, tb=4096):
    """TransE forward: gather embeddings (glue), score in a Pallas kernel.

    tb: max batch tile (lanes).  Rounded down to a multiple of 128 and capped
    at the lane-padded batch.  Default 4096 keeps double-buffered inputs at
    ~3 MiB for D=32 — safe on v5e/v6e/v7x scoped-VMEM defaults.
    """
    b = head.shape[0]
    d = entity_emb.shape[1]

    # Lane-dense tile selection: multiple of 128, no larger than padded batch.
    tile = max(128, (int(tb) // 128) * 128)
    tile = min(tile, pl.cdiv(b, 128) * 128)
    bp = pl.cdiv(b, tile) * tile          # bp is a multiple of tile
    pad = bp - b

    # Pad the *indices* (free, index 0 is always valid) instead of the
    # gathered arrays (HBM copies).
    if pad:
        head = jnp.pad(head, (0, pad))
        relation = jnp.pad(relation, (0, pad))
        tail = jnp.pad(tail, (0, pad))

    # Embedding lookups (nn.Embedding equivalent) — glue, stays in plain JAX.
    # Transposed to (D, BP) so batch lands on the lane axis inside the kernel.
    h = jnp.take(entity_emb, head, axis=0).T        # (D, BP)
    r = jnp.take(relation_emb, relation, axis=0).T  # (D, BP)
    t = jnp.take(entity_emb, tail, axis=0).T        # (D, BP)

    out = pl.pallas_call(
        transe_score_kernel,
        out_shape=jax.ShapeDtypeStruct((1, bp), jnp.float32),
        grid_spec=pl.GridSpec(
            grid=(bp // tile,),
            in_specs=[
                pl.BlockSpec((d, tile), lambda i: (0, i)),  # head embeddings
                pl.BlockSpec((d, tile), lambda i: (0, i)),  # relation embeddings
                pl.BlockSpec((d, tile), lambda i: (0, i)),  # tail embeddings
            ],
            out_specs=pl.BlockSpec((1, tile), lambda i: (0, i)),
        ),
        compiler_params=pltpu.CompilerParams(
            dimension_semantics=("parallel",)  # batch axis shards across TCs
        ),
    )(h, r, t)

    return out[0, :b]


def xavier_uniform(key, shape, dtype=jnp.float32):
    """nn.init.xavier_uniform_ for a 2-D embedding weight (rows, cols)."""
    fan_out, fan_in = shape[0], shape[1]
    bound = jnp.sqrt(6.0 / (fan_in + fan_out))
    return jax.random.uniform(key, shape, dtype, minval=-bound, maxval=bound)


if __name__ == "__main__":
    num_entities = 50
    num_relations = 10
    embedding_dim = 32
    batch = 7

    key = jax.random.PRNGKey(0)
    k_ent, k_rel, k_h, k_r, k_t = jax.random.split(key, 5)

    # Deterministic "xavier_uniform_" initialised embedding tables.
    entity_emb = xavier_uniform(k_ent, (num_entities, embedding_dim))
    relation_emb = xavier_uniform(k_rel, (num_relations, embedding_dim))

    head = jax.random.randint(k_h, (batch,), 0, num_entities, dtype=jnp.int32)
    relation = jax.random.randint(k_r, (batch,), 0, num_relations, dtype=jnp.int32)
    tail = jax.random.randint(k_t, (batch,), 0, num_entities, dtype=jnp.int32)

    score = transe_forward(entity_emb, relation_emb, head, relation, tail)
    score = jax.block_until_ready(score)

    # Pure-JAX reference check of the forward semantics.
    ref = -jnp.linalg.norm(
        entity_emb[head] + relation_emb[relation] - entity_emb[tail],
        ord=2,
        axis=1,
    )
    assert score.shape == (batch,)
    assert jnp.allclose(score, ref, rtol=1e-5, atol=1e-5), (score, ref)

    print("KERNEL_OK")
</pallas_src>

<mosaic_0001>
module attributes {stable_mosaic.version = 11 : i64} {
  func.func @transe_score_kernel(%arg0: i32, %arg1: memref<32x128xf32, #tpu.memory_space<vmem>>, %arg2: memref<32x128xf32, #tpu.memory_space<vmem>>, %arg3: memref<32x128xf32, #tpu.memory_space<vmem>>, %arg4: memref<1x128xf32, #tpu.memory_space<vmem>>) attributes {dimension_semantics = [#tpu.dimension_semantics<parallel>], iteration_bounds = array<i64: 1>, scalar_prefetch = 0 : i64, scratch_operands = 0 : i64, tpu.core_type = #tpu.core_type<tc>, window_params = [{transform_indices = @transform_0, window_bounds = array<i64: 32, 128>}, {transform_indices = @transform_1, window_bounds = array<i64: 32, 128>}, {transform_indices = @transform_2, window_bounds = array<i64: 32, 128>}, {transform_indices = @transform_3, window_bounds = array<i64: 1, 128>}]} {
    %c0 = arith.constant 0 : index
    %c0_0 = arith.constant 0 : index
    %0 = vector.load %arg1[%c0, %c0_0] : memref<32x128xf32, #tpu.memory_space<vmem>>, vector<32x128xf32>
    %c0_1 = arith.constant 0 : index
    %c0_2 = arith.constant 0 : index
    %1 = vector.load %arg2[%c0_1, %c0_2] : memref<32x128xf32, #tpu.memory_space<vmem>>, vector<32x128xf32>
    %c0_3 = arith.constant 0 : index
    %c0_4 = arith.constant 0 : index
    %2 = vector.load %arg3[%c0_3, %c0_4] : memref<32x128xf32, #tpu.memory_space<vmem>>, vector<32x128xf32>
    %3 = arith.addf %0, %1 : vector<32x128xf32>
    %4 = arith.subf %3, %2 : vector<32x128xf32>
    %5 = arith.mulf %4, %4 : vector<32x128xf32>
    %cst = arith.constant dense<0.000000e+00> : vector<128xf32>
    %6 = vector.multi_reduction <add>, %5, %cst [0] : vector<32x128xf32> to vector<128xf32>
    %7 = vector.shape_cast %6 : vector<128xf32> to vector<1x128xf32>
    %8 = math.sqrt %7 : vector<1x128xf32>
    %cst_5 = arith.constant 0.000000e+00 : f32
    %9 = vector.broadcast %cst_5 : f32 to vector<1x128xf32>
    %10 = arith.subf %9, %8 : vector<1x128xf32>
    %c0_6 = arith.constant 0 : index
    %c0_7 = arith.constant 0 : index
    %11 = vector.load %arg4[%c0_6, %c0_7] : memref<1x128xf32, #tpu.memory_space<vmem>>, vector<1x128xf32>
    tpu.vector_store %arg4[%c0_6, %c0_7], %10 {strides = array<i32>} : memref<1x128xf32, #tpu.memory_space<vmem>>, vector<1x128xf32>,
    return
  }
  func.func @transform_0(%arg0: i32) -> (i32, i32) {
    %c0_i32 = arith.constant 0 : i32
    %c0_i32_0 = arith.constant 0 : i32
    return %c0_i32, %arg0 : i32, i32
  }
  func.func @transform_1(%arg0: i32) -> (i32, i32) {
    %c0_i32 = arith.constant 0 : i32
    %c0_i32_0 = arith.constant 0 : i32
    return %c0_i32, %arg0 : i32, i32
  }
  func.func @transform_2(%arg0: i32) -> (i32, i32) {
    %c0_i32 = arith.constant 0 : i32
    %c0_i32_0 = arith.constant 0 : i32
    return %c0_i32, %arg0 : i32, i32
  }
  func.func @transform_3(%arg0: i32) -> (i32, i32) {
    %c0_i32 = arith.constant 0 : i32
    %c0_i32_0 = arith.constant 0 : i32
    return %c0_i32, %arg0 : i32, i32
  }
}

</mosaic_0001>

<bundles_post_ra>
// kernel: transe_forward.1
= control target key start
LH: loop header
LB: loop body
LE: loop exit
PB: predicated region body
PF: predicated region fallthrough
CT: control target
= control target key end

     0   :  { %s126_s0 = inlined_call_operand.vmem [shape: f32[32,128], index: 0, kind: input, shape index: {}]   ;;  %s127_s1 = inlined_call_operand.vmem [shape: f32[32,128], index: 1, kind: input, shape index: {}]   ;;  %s128_s2 = inlined_call_operand.vmem [shape: f32[32,128], index: 2, kind: input, shape index: {}]   ;;  %s129_s3 = inlined_call_operand.vmem [shape: f32[1,128], index: 3, kind: output, shape index: {}]  }
   0x1   :  { %v14_v0 = vld [vmem:[%s126_s0] sm:$0xff]  ;;  %v15_v1 = vld [vmem:[%s126_s0 + $0x8] sm:$0xff]  ;;  %v16_v2 = vld [vmem:[%s126_s0 + $0x10] sm:$0xff] }
   0x2   :  { %v17_v3 = vld [vmem:[%s126_s0 + $0x18] sm:$0xff]  ;;  %v18_v4 = vld [vmem:[%s127_s1] sm:$0xff]  ;;  %v19_v5 = vld [vmem:[%s127_s1 + $0x8] sm:$0xff] }
   0x3   :  { %v20_v6 = vld [vmem:[%s127_s1 + $0x10] sm:$0xff]  ;;  %v21_v7 = vld [vmem:[%s127_s1 + $0x18] sm:$0xff]  ;;  %v22_v8 = vld [vmem:[%s128_s2] sm:$0xff]  ;;  %v26_v9 = vadd.f32 %v18_v4, %v14_v0  ;;  %v27_v10 = vadd.f32 %v19_v5, %v15_v1 }
   0x4   :  { %v23_v11 = vld [vmem:[%s128_s2 + $0x8] sm:$0xff]  ;;  %v24_v12 = vld [vmem:[%s128_s2 + $0x10] sm:$0xff]  ;;  %v25_v13 = vld [vmem:[%s128_s2 + $0x18] sm:$0xff]  ;;  %v28_v14 = vadd.f32 %v20_v6, %v16_v2  ;;  %v29_v15 = vadd.f32 %v21_v7, %v17_v3 }
   0x5   :  { %v30_v16 = vsub.f32 %v26_v9, %v22_v8  ;;  %v31_v17 = vsub.f32 %v27_v10, %v23_v11 }
   0x6   :  { %v32_v18 = vsub.f32 %v28_v14, %v24_v12  ;;  %v33_v19 = vsub.f32 %v29_v15, %v25_v13 }
   0x7   :  { %v34_v20 = vmul.f32 %v30_v16, %v30_v16  ;;  %v35_v21 = vmul.f32 %v31_v17, %v31_v17 }
   0x8   :  { %v36_v22 = vmul.f32 %v32_v18, %v32_v18  ;;  %v37_v23 = vmul.f32 %v33_v19, %v33_v19 }
   0x9   :  { %v38_v24 = vadd.f32 %v35_v21, %v34_v20 }
   0xb   :  { %v39_v25 = vadd.f32 %v38_v24, %v36_v22 }
   0xd   :  { %v40_v26 = vadd.f32 %v39_v25, %v37_v23 }
   0xf   :  { %v41_v27 = vrot.slane %v40_v26, 4 }
  0x11   :  { %v42_v28 = vadd.f32 %v41_v27, %v40_v26 }
  0x13   :  { %v43_v29 = vrot.slane %v42_v28, 2 }
  0x15   :  { %v44_v30 = vadd.f32 %v43_v29, %v42_v28 }
  0x17   :  { %v45_v31 = vrot.slane %v44_v30, 1 }
  0x19   :  { %v46_v32 = vadd.f32 %v45_v31, %v44_v30 }
  0x1b   :  { %65 = vrsqrt.f32 %v46_v32  ;;  %vm54_vm0 = vcmp.eq.f32.partialorder %v46_v32, inf  ;;  %v57_v39 = vand.u32 2147483648, %v46_v32  ;;  %vm56_vm1 = vcmp.eq.f32.partialorder %v46_v32, 0.0 }
  0x21   :  { %v66_v33 = vpop.eup %65 }
  0x22   :  { %v48_v34 = vmul.f32 %v66_v33, %v46_v32 }
  0x24   :  { %v49_v35 = vmul.f32 %v66_v33, %v48_v34 }
  0x26   :  { %v50_v36 = vmul.f32 0.5, %v49_v35 }
  0x28   :  { %v51_v37 = vsub.f32 1.5, %v50_v36 }
  0x2a   :  { %v52_v38 = vmul.f32 %v66_v33, %v51_v37 }
  0x2c   :  { %v53_v40 = vmul.f32 %v52_v38, %v46_v32 }
  0x2e   :  { %v55_v41 = vsel %vm54_vm0, %v46_v32, %v53_v40 }
  0x2f   :  { %v58_v42 = vsel %vm56_vm1, %v57_v39, %v55_v41 }
  0x30   :  { %v59_v43 = vsub.f32 0.0, %v58_v42 }
  0x32   :  { %60 = vst [vmem:[%s129_s3] sm:$0x1] %v59_v43 }

</bundles_post_ra>
